<compile_context>
chip_gen: v5e
topology: v5e:2x2
jax: 0.10.0
libtpu: 0.0.40
codegen_flags: <defaults>
</compile_context>

<pallas_src>
import functools

import jax
import jax.numpy as jnp
from jax.experimental import pallas as pl
from jax.experimental.pallas import tpu as pltpu


def _round_up(x, m):
    return ((x + m - 1) // m) * m


def _supcon_lse_kernel(q_ref, k_ref, o_ref, m_acc, l_acc, r_sum, *,
                       inv_temp, n_valid, tile, pad_cols):
    """Per-anchor log-sum-exp of logits over non-self, non-padded contrasts.

    q_ref: [tile, d_pad] anchor features (native dtype)
    k_ref: [tile, d_pad] contrast features (native dtype)
    o_ref: [tile, 1]     per-anchor LSE in logits units (written on last step)
    """
    qi = pl.program_id(0)
    ki = pl.program_id(1)
    nk = pl.num_programs(1)

    @pl.when(ki == 0)
    def _init():
        m_acc[...] = jnp.full((tile, 1), -1e30, jnp.float32)
        l_acc[...] = jnp.zeros((tile, 1), jnp.float32)

    # Raw similarity tile (anchor . contrast^T), contracting the LAST axes of
    # both operands (no transpose). Operands stay in their native dtype so
    # bf16 inputs use the bf16-native MXU; accumulation is f32.
    s = jax.lax.dot_general(q_ref[...], k_ref[...], (((1,), (1,)), ((), ())),
                            preferred_element_type=jnp.float32)   # [tile,tile]

    # Online max needs NO masking: the self column s_ii = |f_i|^2 >= 0 is
    # always present in the row, so zero-padded columns can never change the
    # max, and including self matches the PyTorch logits_max (the shift
    # cancels exactly in the final LSE regardless).
    m_prev = m_acc[...]
    m_new = jnp.maximum(m_prev, jnp.max(s, axis=1, keepdims=True))

    # exp((s - m) / T): 1/T applied to f32 values post-matmul.
    e = jnp.exp((s - m_new) * inv_temp)

    # Row-sum of exp. Self-exclusion / padded-column masking is only needed on
    # the diagonal tile (and, if the contrast dim is padded, the last tile);
    # predicate it there so interior tiles carry zero mask plumbing.
    r_sum[...] = jnp.sum(e, axis=1, keepdims=True)

    special = qi == ki
    if pad_cols:
        special = jnp.logical_or(special, ki == nk - 1)

    @pl.when(special)
    def _masked():
        row_g = qi * tile + jax.lax.broadcasted_iota(jnp.int32, (tile, tile), 0)
        col_g = ki * tile + jax.lax.broadcasted_iota(jnp.int32, (tile, tile), 1)
        keep = jnp.logical_and(row_g != col_g, col_g < n_valid)
        r_sum[...] = jnp.sum(jnp.where(keep, e, 0.0), axis=1, keepdims=True)

    l_acc[...] = jnp.exp((m_prev - m_new) * inv_temp) * l_acc[...] + r_sum[...]
    m_acc[...] = m_new

    @pl.when(ki == nk - 1)
    def _finish():
        # [tile,1] store is lane-sparse but happens only once per anchor tile.
        o_ref[...] = m_acc[...] * inv_temp + jnp.log(l_acc[...])


def _pick_tile(n_contrast, n_anchor, d_pad, dtype_bytes):
    if n_contrast < 128:
        return _round_up(max(n_contrast, 8), 8)
    tile = 128
    for t in (512, 256):
        # Prefer big tiles (fewer contrast passes / grid steps) but keep at
        # least two anchor tiles when possible so both v7x TensorCores get work.
        if n_contrast >= 2 * t and n_anchor >= 2 * t:
            tile = t
            break
    # Shrink if double-buffered feature blocks + live [tile,tile] f32
    # temporaries would not fit a conservative 32 MiB scoped-VMEM budget.
    while tile > 128 and (4 * tile * d_pad * dtype_bytes
                          + 6 * tile * tile * 4) > 26 * 2**20:
        tile //= 2
    return tile


def supcon_loss(features, labels=None, mask=None, *, temperature=0.07,
                contrast_mode="all", base_temperature=0.07):
    """JAX/Pallas equivalent of SupConLoss.forward."""
    features = jnp.asarray(features)
    if features.ndim < 3:
        raise ValueError("`features` needs to be [bsz, n_views, ...], "
                         "at least 3 dimensions are required")
    if features.ndim > 3:
        features = features.reshape(features.shape[0], features.shape[1], -1)
    bsz, n_views, d = features.shape

    if labels is not None and mask is not None:
        raise ValueError("Cannot define both `labels` and `mask`")
    if labels is None and mask is None:
        mask_b = jnp.eye(bsz, dtype=jnp.float32)                  # SimCLR
    elif labels is not None:
        labels = jnp.asarray(labels).reshape(-1)
        if labels.shape[0] != bsz:
            raise ValueError("Num of labels does not match num of features")
        mask_b = (labels[:, None] == labels[None, :]).astype(jnp.float32)
    else:
        mask_b = jnp.asarray(mask).astype(jnp.float32)

    if contrast_mode == "one":
        anchor_count = 1
    elif contrast_mode == "all":
        anchor_count = n_views
    else:
        raise ValueError("Unknown mode: {}".format(contrast_mode))
    contrast_count = n_views

    # contrast_feature = cat(unbind(features, 1), 0) -> view-major [N, D];
    # the anchors are its first bsz*anchor_count rows in both modes.
    contrast_feature = jnp.transpose(features, (1, 0, 2)).reshape(
        n_views * bsz, d)
    n = bsz * contrast_count
    n_anchor = bsz * anchor_count
    inv_temp = float(1.0 / temperature)

    # ---- positive-pair statistics (plain JAX, O(bsz^2 + N*D), f32) ---------
    #   sum_pos(raw)_i = f_i . class_sum[b(i)] - mask[b,b] * |f_i|^2
    #   cnt_i          = contrast_count * sum_b' mask[b,b'] - mask[b,b]
    feat32 = contrast_feature.astype(jnp.float32)
    view_sum = jnp.sum(features.astype(jnp.float32), axis=1)       # [bsz, D]
    class_sum = mask_b @ view_sum                                  # [bsz, D]
    anchor32 = feat32[:n_anchor]                                   # [na, D]
    class_sum_a = jnp.tile(class_sum, (anchor_count, 1))           # [na, D]
    self_w = jnp.tile(jnp.diag(mask_b), (anchor_count,))           # [na]
    pos_sum_raw = (jnp.sum(anchor32 * class_sum_a, axis=1)
                   - self_w * jnp.sum(anchor32 * anchor32, axis=1))
    cnt = jnp.tile(contrast_count * jnp.sum(mask_b, axis=1) - jnp.diag(mask_b),
                   (anchor_count,))

    # ---- Pallas kernel: per-anchor LSE over non-self contrasts -------------
    d_pad = _round_up(d, 128)
    dtype_bytes = jnp.dtype(contrast_feature.dtype).itemsize
    tile = _pick_tile(n, n_anchor, d_pad, dtype_bytes)
    n_pad = _round_up(n, tile)
    n_anchor_pad = _round_up(n_anchor, tile)

    feat = contrast_feature                    # native dtype into the kernel
    if (n_pad, d_pad) != (n, d):
        feat = jnp.zeros((n_pad, d_pad), feat.dtype).at[:n, :d].set(feat)

    kernel = functools.partial(
        _supcon_lse_kernel, inv_temp=inv_temp, n_valid=int(n), tile=int(tile),
        pad_cols=bool(n_pad != n))

    lse_padded = pl.pallas_call(
        kernel,
        out_shape=jax.ShapeDtypeStruct((n_anchor_pad, 1), jnp.float32),
        grid_spec=pltpu.PrefetchScalarGridSpec(
            num_scalar_prefetch=0,
            grid=(n_anchor_pad // tile, n_pad // tile),
            in_specs=[
                pl.BlockSpec((tile, d_pad), lambda qi, ki: (qi, 0)),  # anchors
                pl.BlockSpec((tile, d_pad), lambda qi, ki: (ki, 0)),  # contrasts
            ],
            out_specs=pl.BlockSpec((tile, 1), lambda qi, ki: (qi, 0)),
            scratch_shapes=[
                pltpu.VMEM((tile, 1), jnp.float32),   # running max
                pltpu.VMEM((tile, 1), jnp.float32),   # running exp-sum
                pltpu.VMEM((tile, 1), jnp.float32),   # per-step row sum
            ],
        ),
        compiler_params=pltpu.CompilerParams(
            dimension_semantics=("parallel", "arbitrary"),
            vmem_limit_bytes=32 * 1024 * 1024,
        ),
    )(feat, feat)

    lse = lse_padded[:n_anchor, 0]

    # mean_log_prob_pos = (sum_pos(logits) - cnt * LSE) / cnt
    # NOTE: anchors with zero positives divide by zero -> NaN, matching the
    # reference PyTorch module (whose scalar mean also propagates the NaN).
    mean_log_prob_pos = (inv_temp * pos_sum_raw - cnt * lse) / cnt
    loss = -(temperature / base_temperature) * mean_log_prob_pos
    # loss.view(anchor_count, batch_size).mean() == mean over all anchors.
    return jnp.mean(loss)


def _reference_supcon(features, labels=None, mask=None, temperature=0.07,
                      contrast_mode="all", base_temperature=0.07):
    """Pure-JAX mirror of the PyTorch SupConLoss.forward (for testing)."""
    bsz, n_views, d = features.shape
    if labels is None and mask is None:
        mask = jnp.eye(bsz, dtype=jnp.float32)
    elif labels is not None:
        labels = jnp.asarray(labels).reshape(-1, 1)
        mask = (labels == labels.T).astype(jnp.float32)
    else:
        mask = jnp.asarray(mask).astype(jnp.float32)
    contrast_count = n_views
    cf = jnp.transpose(features, (1, 0, 2)).reshape(n_views * bsz, d)
    cf = cf.astype(jnp.float32)
    if contrast_mode == "one":
        af, anchor_count = cf[:bsz], 1
    else:
        af, anchor_count = cf, n_views
    adc = (af @ cf.T) / temperature
    logits = adc - jnp.max(adc, axis=1, keepdims=True)
    mask = jnp.tile(mask, (anchor_count, contrast_count))
    n_a = bsz * anchor_count
    logits_mask = jnp.ones_like(mask).at[
        jnp.arange(n_a), jnp.arange(n_a)].set(0.0)
    mask = mask * logits_mask
    exp_logits = jnp.exp(logits) * logits_mask
    log_prob = logits - jnp.log(exp_logits.sum(1, keepdims=True))
    mean_log_prob_pos = (mask * log_prob).sum(1) / mask.sum(1)
    loss = -(temperature / base_temperature) * mean_log_prob_pos
    return loss.mean()


if __name__ == "__main__":
    key = jax.random.PRNGKey(0)
    k1, k2, k3 = jax.random.split(key, 3)

    # Test 1: small supervised case (N = 16, single tile).
    bsz, n_views, dim = 8, 2, 32
    feats = jax.random.normal(k1, (bsz, n_views, dim), dtype=jnp.float32)
    feats = feats / jnp.linalg.norm(feats, axis=-1, keepdims=True)
    labels = jnp.array([0, 1, 2, 3, 0, 1, 2, 3], dtype=jnp.int32)
    out = jax.block_until_ready(supcon_loss(feats, labels=labels))
    ref = _reference_supcon(feats, labels=labels)
    assert jnp.allclose(out, ref, atol=1e-3, rtol=1e-3), (out, ref)

    # Test 2: SimCLR path (no labels / mask).
    out2 = jax.block_until_ready(supcon_loss(feats))
    ref2 = _reference_supcon(feats)
    assert jnp.allclose(out2, ref2, atol=1e-3, rtol=1e-3), (out2, ref2)

    # Test 3: multi-tile grid with row/col padding (N = 160 -> 2x2 tiles of 128).
    bsz3, n_views3, dim3 = 80, 2, 48
    feats3 = jax.random.normal(k2, (bsz3, n_views3, dim3), dtype=jnp.float32)
    feats3 = feats3 / jnp.linalg.norm(feats3, axis=-1, keepdims=True)
    labels3 = (jnp.arange(bsz3) % 10).astype(jnp.int32)
    out3 = jax.block_until_ready(supcon_loss(feats3, labels=labels3))
    ref3 = _reference_supcon(feats3, labels=labels3)
    assert jnp.allclose(out3, ref3, atol=1e-3, rtol=1e-3), (out3, ref3)

    # Test 4: contrast_mode='one' (view-0 anchors only).
    out4 = jax.block_until_ready(
        supcon_loss(feats3, labels=labels3, contrast_mode="one"))
    ref4 = _reference_supcon(feats3, labels=labels3, contrast_mode="one")
    assert jnp.allclose(out4, ref4, atol=1e-3, rtol=1e-3), (out4, ref4)

    # Test 5: explicit (asymmetric) [bsz, bsz] contrastive mask.
    rmask = (jax.random.uniform(k3, (bsz3, bsz3)) < 0.2).astype(jnp.float32)
    rmask = jnp.maximum(rmask, jnp.eye(bsz3))   # guarantee >= 1 positive/row
    out5 = jax.block_until_ready(supcon_loss(feats3, mask=rmask))
    ref5 = _reference_supcon(feats3, mask=rmask)
    assert jnp.allclose(out5, ref5, atol=1e-3, rtol=1e-3), (out5, ref5)

    print("KERNEL_OK")
</pallas_src>

<mosaic_0001>
module attributes {stable_mosaic.version = 11 : i64} {
  func.func @_supcon_lse_kernel(%arg0: i32, %arg1: i32, %arg2: memref<16x128xf32, #tpu.memory_space<vmem>>, %arg3: memref<16x128xf32, #tpu.memory_space<vmem>>, %arg4: memref<16x1xf32, #tpu.memory_space<vmem>>, %arg5: memref<16x1xf32, #tpu.memory_space<vmem>>, %arg6: memref<16x1xf32, #tpu.memory_space<vmem>>, %arg7: memref<16x1xf32, #tpu.memory_space<vmem>>) attributes {dimension_semantics = [#tpu.dimension_semantics<parallel>, #tpu.dimension_semantics<arbitrary>], iteration_bounds = array<i64: 1, 1>, scalar_prefetch = 0 : i64, scratch_operands = 3 : i64, tpu.core_type = #tpu.core_type<tc>, window_params = [{transform_indices = @transform_0, window_bounds = array<i64: 16, 128>}, {transform_indices = @transform_1, window_bounds = array<i64: 16, 128>}, {transform_indices = @transform_2, window_bounds = array<i64: 16, 1>}]} {
    %c0_i32 = arith.constant 0 : i32
    %0 = arith.cmpi eq, %arg1, %c0_i32 : i32
    %1 = arith.extui %0 : i1 to i32
    %c0_i32_0 = arith.constant 0 : i32
    %2 = arith.cmpi ne, %1, %c0_i32_0 : i32
    scf.if %2 {
      %cst_23 = arith.constant -1.000000e+30 : f32
      %34 = vector.broadcast %cst_23 : f32 to vector<16x1xf32>
      %c0_24 = arith.constant 0 : index
      %c0_25 = arith.constant 0 : index
      %35 = vector.load %arg5[%c0_24, %c0_25] : memref<16x1xf32, #tpu.memory_space<vmem>>, vector<16x1xf32>
      tpu.vector_store %arg5[%c0_24, %c0_25], %34 {strides = array<i32>} : memref<16x1xf32, #tpu.memory_space<vmem>>, vector<16x1xf32>,
      %cst_26 = arith.constant 0.000000e+00 : f32
      %36 = vector.broadcast %cst_26 : f32 to vector<16x1xf32>
      %c0_27 = arith.constant 0 : index
      %c0_28 = arith.constant 0 : index
      %37 = vector.load %arg6[%c0_27, %c0_28] : memref<16x1xf32, #tpu.memory_space<vmem>>, vector<16x1xf32>
      tpu.vector_store %arg6[%c0_27, %c0_28], %36 {strides = array<i32>} : memref<16x1xf32, #tpu.memory_space<vmem>>, vector<16x1xf32>,
    } else {
    }
    %c0 = arith.constant 0 : index
    %c0_1 = arith.constant 0 : index
    %3 = vector.load %arg2[%c0, %c0_1] : memref<16x128xf32, #tpu.memory_space<vmem>>, vector<16x128xf32>
    %c0_2 = arith.constant 0 : index
    %c0_3 = arith.constant 0 : index
    %4 = vector.load %arg3[%c0_2, %c0_3] : memref<16x128xf32, #tpu.memory_space<vmem>>, vector<16x128xf32>
    %cst = arith.constant dense<0.000000e+00> : vector<16x16xf32>
    %5 = tpu.matmul %3, %4, %cst {dimension_numbers = #tpu.dot_dimension_numbers<[1], [1], [0], [0], [0, 0, 1, 0], [], []>} : vector<16x128xf32>, vector<16x128xf32>, vector<16x16xf32> -> vector<16x16xf32>
    %c0_4 = arith.constant 0 : index
    %c0_5 = arith.constant 0 : index
    %6 = vector.load %arg5[%c0_4, %c0_5] : memref<16x1xf32, #tpu.memory_space<vmem>>, vector<16x1xf32>
    %cst_6 = arith.constant dense<0xFF800000> : vector<16xf32>
    %7 = vector.multi_reduction <maximumf>, %5, %cst_6 [1] : vector<16x16xf32> to vector<16xf32>
    %8 = vector.shape_cast %7 : vector<16xf32> to vector<16x1xf32>
    %9 = arith.maximumf %6, %8 : vector<16x1xf32>
    %10 = vector.broadcast %9 : vector<16x1xf32> to vector<16x16xf32>
    %11 = arith.subf %5, %10 : vector<16x16xf32>
    %cst_7 = arith.constant 14.2857141 : f32
    %12 = vector.broadcast %cst_7 : f32 to vector<16x16xf32>
    %13 = arith.mulf %11, %12 : vector<16x16xf32>
    %14 = math.exp %13 : vector<16x16xf32>
    %cst_8 = arith.constant dense<0.000000e+00> : vector<16xf32>
    %15 = vector.multi_reduction <add>, %14, %cst_8 [1] : vector<16x16xf32> to vector<16xf32>
    %16 = vector.shape_cast %15 : vector<16xf32> to vector<16x1xf32>
    %c0_9 = arith.constant 0 : index
    %c0_10 = arith.constant 0 : index
    %17 = vector.load %arg7[%c0_9, %c0_10] : memref<16x1xf32, #tpu.memory_space<vmem>>, vector<16x1xf32>
    tpu.vector_store %arg7[%c0_9, %c0_10], %16 {strides = array<i32>} : memref<16x1xf32, #tpu.memory_space<vmem>>, vector<16x1xf32>,
    %18 = arith.cmpi eq, %arg0, %arg1 : i32
    %19 = arith.extui %18 : i1 to i32
    %c0_i32_11 = arith.constant 0 : i32
    %20 = arith.cmpi ne, %19, %c0_i32_11 : i32
    scf.if %20 {
      %c16_i32 = arith.constant 16 : i32
      %34 = arith.muli %arg0, %c16_i32 : i32
      %35 = tpu.iota {dimensions = array<i32: 0>} : vector<16x16xi32>
      %36 = vector.broadcast %34 : i32 to vector<16x16xi32>
      %37 = arith.addi %36, %35 : vector<16x16xi32>
      %c16_i32_23 = arith.constant 16 : i32
      %38 = arith.muli %arg1, %c16_i32_23 : i32
      %39 = tpu.iota {dimensions = array<i32: 1>} : vector<16x16xi32>
      %40 = vector.broadcast %38 : i32 to vector<16x16xi32>
      %41 = arith.addi %40, %39 : vector<16x16xi32>
      %42 = arith.cmpi ne, %37, %41 : vector<16x16xi32>
      %c16_i32_24 = arith.constant 16 : i32
      %43 = vector.broadcast %c16_i32_24 : i32 to vector<16x16xi32>
      %44 = arith.cmpi slt, %41, %43 : vector<16x16xi32>
      %45 = arith.andi %42, %44 : vector<16x16xi1>
      %cst_25 = arith.constant 0.000000e+00 : f32
      %46 = vector.broadcast %cst_25 : f32 to vector<16x16xf32>
      %47 = arith.select %45, %14, %46 : vector<16x16xi1>, vector<16x16xf32>
      %cst_26 = arith.constant dense<0.000000e+00> : vector<16xf32>
      %48 = vector.multi_reduction <add>, %47, %cst_26 [1] : vector<16x16xf32> to vector<16xf32>
      %49 = vector.shape_cast %48 : vector<16xf32> to vector<16x1xf32>
      %c0_27 = arith.constant 0 : index
      %c0_28 = arith.constant 0 : index
      %50 = vector.load %arg7[%c0_27, %c0_28] : memref<16x1xf32, #tpu.memory_space<vmem>>, vector<16x1xf32>
      tpu.vector_store %arg7[%c0_27, %c0_28], %49 {strides = array<i32>} : memref<16x1xf32, #tpu.memory_space<vmem>>, vector<16x1xf32>,
    } else {
    }
    %21 = arith.subf %6, %9 : vector<16x1xf32>
    %cst_12 = arith.constant 14.2857141 : f32
    %22 = vector.broadcast %cst_12 : f32 to vector<16x1xf32>
    %23 = arith.mulf %21, %22 : vector<16x1xf32>
    %24 = math.exp %23 : vector<16x1xf32>
    %c0_13 = arith.constant 0 : index
    %c0_14 = arith.constant 0 : index
    %25 = vector.load %arg6[%c0_13, %c0_14] : memref<16x1xf32, #tpu.memory_space<vmem>>, vector<16x1xf32>
    %26 = arith.mulf %24, %25 : vector<16x1xf32>
    %c0_15 = arith.constant 0 : index
    %c0_16 = arith.constant 0 : index
    %27 = vector.load %arg7[%c0_15, %c0_16] : memref<16x1xf32, #tpu.memory_space<vmem>>, vector<16x1xf32>
    %28 = arith.addf %26, %27 : vector<16x1xf32>
    %c0_17 = arith.constant 0 : index
    %c0_18 = arith.constant 0 : index
    %29 = vector.load %arg6[%c0_17, %c0_18] : memref<16x1xf32, #tpu.memory_space<vmem>>, vector<16x1xf32>
    tpu.vector_store %arg6[%c0_17, %c0_18], %28 {strides = array<i32>} : memref<16x1xf32, #tpu.memory_space<vmem>>, vector<16x1xf32>,
    %c0_19 = arith.constant 0 : index
    %c0_20 = arith.constant 0 : index
    %30 = vector.load %arg5[%c0_19, %c0_20] : memref<16x1xf32, #tpu.memory_space<vmem>>, vector<16x1xf32>
    tpu.vector_store %arg5[%c0_19, %c0_20], %9 {strides = array<i32>} : memref<16x1xf32, #tpu.memory_space<vmem>>, vector<16x1xf32>,
    %c0_i32_21 = arith.constant 0 : i32
    %31 = arith.cmpi eq, %arg1, %c0_i32_21 : i32
    %32 = arith.extui %31 : i1 to i32
    %c0_i32_22 = arith.constant 0 : i32
    %33 = arith.cmpi ne, %32, %c0_i32_22 : i32
    scf.if %33 {
      %c0_23 = arith.constant 0 : index
      %c0_24 = arith.constant 0 : index
      %34 = vector.load %arg5[%c0_23, %c0_24] : memref<16x1xf32, #tpu.memory_space<vmem>>, vector<16x1xf32>
      %cst_25 = arith.constant 14.2857141 : f32
      %35 = vector.broadcast %cst_25 : f32 to vector<16x1xf32>
      %36 = arith.mulf %34, %35 : vector<16x1xf32>
      %c0_26 = arith.constant 0 : index
      %c0_27 = arith.constant 0 : index
      %37 = vector.load %arg6[%c0_26, %c0_27] : memref<16x1xf32, #tpu.memory_space<vmem>>, vector<16x1xf32>
      %38 = math.log %37 : vector<16x1xf32>
      %39 = arith.addf %36, %38 : vector<16x1xf32>
      %c0_28 = arith.constant 0 : index
      %c0_29 = arith.constant 0 : index
      %40 = vector.load %arg4[%c0_28, %c0_29] : memref<16x1xf32, #tpu.memory_space<vmem>>, vector<16x1xf32>
      tpu.vector_store %arg4[%c0_28, %c0_29], %39 {strides = array<i32>} : memref<16x1xf32, #tpu.memory_space<vmem>>, vector<16x1xf32>,
    } else {
    }
    return
  }
  func.func @transform_0(%arg0: i32, %arg1: i32) -> (i32, i32) {
    %c0_i32 = arith.constant 0 : i32
    %c0_i32_0 = arith.constant 0 : i32
    return %arg0, %c0_i32 : i32, i32
  }
  func.func @transform_1(%arg0: i32, %arg1: i32) -> (i32, i32) {
    %c0_i32 = arith.constant 0 : i32
    %c0_i32_0 = arith.constant 0 : i32
    return %arg1, %c0_i32 : i32, i32
  }
  func.func @transform_2(%arg0: i32, %arg1: i32) -> (i32, i32) {
    %c0_i32 = arith.constant 0 : i32
    %c0_i32_0 = arith.constant 0 : i32
    return %arg0, %c0_i32 : i32, i32
  }
}

</mosaic_0001>

<bundles_post_ra>
// kernel: tpu_custom_call.1
= control target key start
LH: loop header
LB: loop body
LE: loop exit
PB: predicated region body
PF: predicated region fallthrough
CT: control target
= control target key end

     0   :  { %7 = vsyncpa [#allocation6], 0  ;;  %s320_s0 = inlined_call_operand.hbm [shape: f32[16,128], index: 0, kind: input, shape index: {}]   ;;  %s321_s1 = inlined_call_operand.hbm [shape: f32[16,128], index: 1, kind: input, shape index: {}]   ;;  %s322_s2 = inlined_call_operand.vmem [shape: f32[16,1], index: 2, kind: output, shape index: {}]  }
   0x1   :  { %s13_s11 = sshll.u32 %s320_s0, 4  ;;  %s14_s11 = int_to_ptr.hbm [resolvable:$true] %s13_s11 }
   0x2   :  { %8 = vsyncpa [#allocation8], 0  ;;  %s266_s12 = smov [#allocation5]   ;;  %s26_s16 = sshll.u32 %s321_s1, 4  ;;  %s27_s16 = int_to_ptr.hbm [resolvable:$true] %s26_s16 }
   0x3   :  { %s15_s13 = sshll.u32 %s266_s12, 4  ;;  %s267_s17 = smov 128   ;;  %s16_s13 = int_to_ptr.vmem [resolvable:$true] %s15_s13 }
   0x4   :  { %s268_s18 = smov 8   ;;  %s269_s19 = smov [#allocation7]  }
   0x5   :  { %21 = dma.hbm_to_vmem [thread:$0]  %s14_s11, 256, %s16_s13, [#allocation6], %s267_s17, %s267_s17, %s268_s18  }
   0x6   :  { %s28_s20 = sshll.u32 %s269_s19, 4  ;;  %s29_s20 = int_to_ptr.vmem [resolvable:$true] %s28_s20 }
   0x7   :  { %34 = dma.hbm_to_vmem [thread:$0]  %s27_s16, 256, %s29_s20, [#allocation8], %s267_s17, %s267_s17, %s268_s18  }
   0x8   :  { %262 = dma.done.wait [#allocation6], 256  }
   0x9   :  { %263 = vsyncadd [#allocation6], 4294967040 }
   0xa   :  { %264 = dma.done.wait [#allocation8], 256  }
   0xb   :  { %265 = vsyncadd [#allocation8], 4294967040  ;;  %v55_v0 = vld [vmem:[#allocation7 + $0x8] sm:$0xff]  ;;  %v54_v1 = vld [vmem:[#allocation7] sm:$0xff]  ;;  %vm47_vm0 = vcmask 7168   ;;  %v271_v5 = vmov 0.0   ;;  %v122_v20 = vlaneseq }
   0xc   :  { %70 = vmatpush.xpose.msra.mxu0 %v55_v0  ;;  %191 = vmatpush.xpose.msra.mxu1 %v55_v0  ;;  %v52_v2 = vld [vmem:[#allocation5] sm:$0xff]  ;;  %v53_v3 = vld [vmem:[#allocation5 + $0x8] sm:$0xff]  ;;  %v270_v4 = vmov -1e+30   ;;  %50 = vst.msk [vmem:[#allocation3] sm:$0xff] %vm47_vm0, %v271_v5  ;;  %vm81_vm1 = vcmask 130048  }
   0xd   :  { %48 = vst.msk [vmem:[#allocation2] sm:$0xff] %vm47_vm0, %v270_v4  ;;  %v272_v10 = vmov 0   ;;  %v123_v23 = vshrl.u32 %v122_v20, 7  ;;  %v130_v24 = vand.u32 127, %v122_v20 }
   0xe   :  { %49 = vst.msk [vmem:[#allocation2 + $0x8] sm:$0xff] %vm47_vm0, %v270_v4  ;;  %200 = vset.pattern.permute.xlu1 %v272_v10  ;;  %201 = vset.pattern.permute.xlu0 %v272_v10 }
   0xf   :  { %51 = vst.msk [vmem:[#allocation3 + $0x8] sm:$0xff] %vm47_vm0, %v271_v5  ;;  %vm133_vm2 = vcmp.ne.s32.totalorder %v123_v23, %v130_v24  ;;  %vm135_vm3 = vcmp.lt.s32.totalorder %v130_v24, 16  ;;  %v124_v29 = vadd.s32 8, %v123_v23 }
  0x10   :  { %71 = vmatpush.xpose.msra.mxu0 %v54_v1  ;;  %192 = vmatpush.xpose.msra.mxu1 %v54_v1  ;;  %vm136_vm4 = vmand %vm133_vm2, %vm135_vm3 }
  0x11   :  { %vm134_vm5 = vcmp.ne.s32.totalorder %v124_v29, %v130_v24 }
  0x12   :  { %vm137_vm6 = vmand %vm134_vm5, %vm135_vm3 }
  0x13   :  { %72 = vmatmul.f32.vlgmr.msra.gmra.mxu0 %v52_v2  ;;  %75 = vmatmul.f32.vlgmr.msra.gmra.mxu1 %v53_v3  ;;  %v156_v46 = vld [vmem:[#allocation3] sm:$0xff] }
  0x14   :  { %v79_v11 = vld [vmem:[#allocation2] sm:$0xff] }
  0x15   :  { %v80_v15 = vld [vmem:[#allocation2 + $0x8] sm:$0xff] }
  0x16   :  { %v157_v53 = vld [vmem:[#allocation3 + $0x8] sm:$0xff] }
  0x90   :  { %v73_v6 = vpop.f32.mrf.mxu0  ;;  %v76_v8 = vpop.f32.mrf.mxu1 }
  0x91   :  { %v82_v7 = vsel %vm81_vm1, %v73_v6, -inf  ;;  %v85_v9 = vsel %vm81_vm1, %v76_v8, -inf }
  0x92   :  { %83 = vmax.xlane.f32.xlu0 %v82_v7 }
  0x9a   :  { %86 = vmax.xlane.f32.xlu0 %v85_v9 }
 0x105   :  { %v84_v12 = vpop.xlane.xlu0 %83 }
 0x106   :  { %v88_v13 = vmax.f32 %v79_v11, %v84_v12 }
 0x108   :  { %v148_v14 = vsub.f32 %v79_v11, %v88_v13  ;;  %166 = vst.msk [vmem:[#allocation2] sm:$0xff] %vm47_vm0, %v88_v13  ;;  %92 = vperm.xlu1 %200, %v88_v13  }
 0x10a   :  { %v150_v39 = vmul.f32 14.285714, %v148_v14 }
 0x10c   :  { %v152_v40 = vmul.f32 1.442695, %v150_v39 }
 0x10d   :  { %v87_v16 = vpop.xlane.xlu0 %86 }
 0x10e   :  { %v89_v17 = vmax.f32 %v80_v15, %v87_v16 }
 0x10f   :  { %v171_v58 = vld [vmem:[#allocation2] sm:$0xff] }
 0x110   :  { %v149_v18 = vsub.f32 %v80_v15, %v89_v17  ;;  %167 = vst.msk [vmem:[#allocation2 + $0x8] sm:$0xff] %vm47_vm0, %v89_v17  ;;  %97 = vperm.xlu1 %200, %v89_v17   ;;  %v173_v60 = vmul.f32 14.285714, %v171_v58 }
 0x112   :  { %v151_v41 = vmul.f32 14.285714, %v149_v18 }
 0x114   :  { %v154_v44 = vmul.f32 1.442695, %v151_v41 }
 0x117   :  { %v172_v0 = vld [vmem:[#allocation2 + $0x8] sm:$0xff] }
 0x118   :  { %v174_v2 = vmul.f32 14.285714, %v172_v0 }
 0x17a   :  { %v93_v19 = vpop.permute.xlu1 %92 }
 0x17b   :  { %v100_v21 = vsub.f32 %v73_v6, %v93_v19 }
 0x17d   :  { %v102_v22 = vmul.f32 14.285714, %v100_v21 }
 0x17f   :  { %v104_v25 = vmul.f32 1.442695, %v102_v22 }
 0x181   :  { %202 = vpow2.f32 %v104_v25 }
 0x182   :  { %v98_v26 = vpop.permute.xlu1 %97 }
 0x183   :  { %v101_v27 = vsub.f32 %v76_v8, %v98_v26 }
 0x185   :  { %v103_v28 = vmul.f32 14.285714, %v101_v27 }
 0x187   :  { %v203_v30 = vpop.eup %202  ;;  %v106_v31 = vmul.f32 1.442695, %v103_v28 }
 0x188   :  { %v108_v32 = vsel %vm81_vm1, %v203_v30, 0.0  ;;  %v138_v33 = vsel %vm136_vm4, %v203_v30, 0.0 }
 0x189   :  { %204 = vpow2.f32 %v106_v31  ;;  %109 = vadd.xlane.f32.xlu2 %v108_v32  ;;  %v140_v34 = vsel %vm81_vm1, %v138_v33, 0.0 }
 0x18a   :  { %141 = vadd.xlane.f32.xlu0 %v140_v34  ;;  %206 = vpow2.f32 %v152_v40 }
 0x18b   :  { %208 = vpow2.f32 %v154_v44 }
 0x18f   :  { %v205_v35 = vpop.eup %204 }
 0x190   :  { %v111_v36 = vsel %vm81_vm1, %v205_v35, 0.0  ;;  %v139_v37 = vsel %vm137_vm6, %v205_v35, 0.0  ;;  %v207_v45 = vpop.eup %206 }
 0x191   :  { %112 = vadd.xlane.f32.xlu2 %v111_v36  ;;  %v143_v38 = vsel %vm81_vm1, %v139_v37, 0.0  ;;  %v158_v47 = vmul.f32 %v207_v45, %v156_v46  ;;  %v209_v52 = vpop.eup %208 }
 0x192   :  { %144 = vadd.xlane.f32.xlu1 %v143_v38  ;;  %v159_v54 = vmul.f32 %v209_v52, %v157_v53 }
 0x1fc   :  { %v110_v42 = vpop.xlane.xlu2 %109 }
 0x1fd   :  { %115 = vst.msk [vmem:[#allocation4] sm:$0xff] %vm47_vm0, %v110_v42  ;;  %v142_v43 = vpop.xlane.xlu0 %141 }
 0x1fe   :  { %146 = vst.msk [vmem:[#allocation4] sm:$0xff] %vm47_vm0, %v142_v43 }
 0x204   :  { %v113_v48 = vpop.xlane.xlu2 %112 }
 0x205   :  { %v160_v49 = vld [vmem:[#allocation4] sm:$0xff]  ;;  %116 = vst.msk [vmem:[#allocation4 + $0x8] sm:$0xff] %vm47_vm0, %v113_v48  ;;  %v145_v50 = vpop.xlane.xlu1 %144 }
 0x206   :  { %v162_v51 = vadd.f32 %v160_v49, %v158_v47  ;;  %147 = vst.msk [vmem:[#allocation4 + $0x8] sm:$0xff] %vm47_vm0, %v145_v50 }
 0x208   :  { %164 = vst.msk [vmem:[#allocation3] sm:$0xff] %vm47_vm0, %v162_v51 }
 0x20d   :  { %v161_v55 = vld [vmem:[#allocation4 + $0x8] sm:$0xff] }
 0x20e   :  { %v163_v56 = vadd.f32 %v161_v55, %v159_v54 }
 0x20f   :  { %v175_v57 = vld [vmem:[#allocation3] sm:$0xff] }
 0x210   :  { %210 = vlog2.f32 %v175_v57  ;;  %165 = vst.msk [vmem:[#allocation3 + $0x8] sm:$0xff] %vm47_vm0, %v163_v56 }
 0x216   :  { %v211_v59 = vpop.eup %210 }
 0x217   :  { %v178_v61 = vmul.f32 0.6931472, %v211_v59  ;;  %v176_v62 = vld [vmem:[#allocation3 + $0x8] sm:$0xff] }
 0x218   :  { %212 = vlog2.f32 %v176_v62 }
 0x219   :  { %v181_v63 = vadd.f32 %v178_v61, %v173_v60 }
 0x21b   :  { %183 = vst.msk [vmem:[%s322_s2] sm:$0xff] %vm47_vm0, %v181_v63 }
 0x21e   :  { %v213_v1 = vpop.eup %212 }
 0x21f   :  { %v180_v3 = vmul.f32 0.6931472, %v213_v1 }
 0x221   :  { %v182_v4 = vadd.f32 %v180_v3, %v174_v2 }
 0x223   :  { %184 = vst.msk [vmem:[%s322_s2 + $0x8] sm:$0xff] %vm47_vm0, %v182_v4 }
 0x224   :  { %189 = vsyncpa [#allocation6], 1 }
 0x225   :  { %190 = vsyncpa [#allocation8], 1 }

</bundles_post_ra>
